<compile_context>
chip_gen: v6e
topology: v6e:2x2x1
jax: 0.10.0
libtpu: 0.0.40
codegen_flags: <defaults>
</compile_context>

<pallas_src>
import jax
import jax.numpy as jnp
from jax.experimental import pallas as pl
from jax.experimental.pallas import tpu as pltpu

N_EMBD = 128
HIDDEN = 4 * N_EMBD   # 512
DROPOUT = 0.2         # unused at inference (identity)

_COMPUTE_DTYPE = jnp.bfloat16   # MXU peak dtype; accumulation stays f32
_BF16_MIN_ROWS = 16             # bf16 sublane packing: row tile multiple of 16


def _round_up(x, m):
    return ((x + m - 1) // m) * m


def _pick_tm(m, tm_max=512, base=_BF16_MIN_ROWS):
    """Large row tile (<= tm_max) to fill the MXU, but small enough to expose
    >= 2 grid steps (two TensorCores on v7x) whenever M allows it."""
    m_base = _round_up(m, base)
    if m_base <= base:
        return base
    return min(tm_max, _round_up((m_base + 1) // 2, base))


def ffn_kernel(x_ref, w1_ref, b1_ref, w2_ref, b2_ref, o_ref):
    # x_ref: (tm, E) bf16 | w1_ref: (E, H) bf16 | b1_ref: (1, H) f32
    # w2_ref: (H, E) bf16 | b2_ref: (1, E) f32  | o_ref: (tm, E) out dtype
    x = x_ref[...]
    b1 = b1_ref[...]          # loaded once; implicit broadcast in the add
    b2 = b2_ref[...]
    h = jnp.dot(x, w1_ref[...], preferred_element_type=jnp.float32) + b1
    h = jnp.maximum(h, 0.0)                                   # ReLU
    h = h.astype(w2_ref.dtype)                                # bf16 for the MXU
    y = jnp.dot(h, w2_ref[...], preferred_element_type=jnp.float32) + b2
    o_ref[...] = y.astype(o_ref.dtype)
    # NOTE: dropout omitted (eval-mode identity).


def feed_forward(x, w1, b1, w2, b2, *, tm=None):
    """x: (B, T, n_embd) -> (B, T, n_embd). Eval-mode GPT-2 MLP."""
    B, T, E = x.shape
    H = w1.shape[1]
    M = B * T

    if tm is None:
        tm = _pick_tm(M)
    m_pad = _round_up(M, tm)
    grid = m_pad // tm

    x2d = x.reshape(M, E).astype(_COMPUTE_DTYPE)
    if m_pad != M:
        x2d = jnp.pad(x2d, ((0, m_pad - M), (0, 0)))
    w1c = w1.astype(_COMPUTE_DTYPE)
    w2c = w2.astype(_COMPUTE_DTYPE)
    b1_2d = b1.reshape(1, H).astype(jnp.float32)
    b2_2d = b2.reshape(1, E).astype(jnp.float32)

    out_dtype = x.dtype
    cost = pl.CostEstimate(
        flops=4 * m_pad * E * H,          # two (m_pad,E)@(E,H)-sized matmuls
        transcendentals=0,
        bytes_accessed=(x2d.size * x2d.dtype.itemsize
                        + w1c.size * w1c.dtype.itemsize
                        + w2c.size * w2c.dtype.itemsize
                        + b1_2d.size * 4 + b2_2d.size * 4
                        + m_pad * E * jnp.dtype(out_dtype).itemsize),
    )

    def _in_specs(single_buffer_weights):
        wkw = dict(pipeline_mode=pl.Buffered(1)) if single_buffer_weights else {}
        return [
            pl.BlockSpec((tm, E), lambda i: (i, 0)),          # x rows (pipelined)
            pl.BlockSpec((E, H), lambda i: (0, 0), **wkw),    # W1 (resident)
            pl.BlockSpec((1, H), lambda i: (0, 0), **wkw),    # b1 (resident)
            pl.BlockSpec((H, E), lambda i: (0, 0), **wkw),    # W2 (resident)
            pl.BlockSpec((1, E), lambda i: (0, 0), **wkw),    # b2 (resident)
        ]

    def _run(single_buffer_weights):
        return pl.pallas_call(
            ffn_kernel,
            out_shape=jax.ShapeDtypeStruct((m_pad, E), out_dtype),
            grid_spec=pltpu.PrefetchScalarGridSpec(
                num_scalar_prefetch=0,
                grid=(grid,),
                in_specs=_in_specs(single_buffer_weights),
                out_specs=pl.BlockSpec((tm, E), lambda i: (i, 0)),
            ),
            compiler_params=pltpu.CompilerParams(
                dimension_semantics=("parallel",)),
            cost_estimate=cost,
        )(x2d, w1c, b1_2d, w2c, b2_2d)

    try:
        out = _run(True)
    except Exception:
        # TODO(synk): pl.Buffered(1) single-buffering of resident weight blocks
        # rejected by this jax build; fall back to default double-buffering.
        out = _run(False)

    return out[:M].reshape(B, T, E)


def init_params(key, n_embd=N_EMBD, hidden=HIDDEN, dtype=jnp.float32):
    # Deterministic init mimicking PyTorch Linear default: U(-1/sqrt(fan_in), +1/sqrt(fan_in))
    k1, k2, k3, k4 = jax.random.split(key, 4)
    lim1 = 1.0 / (n_embd ** 0.5)
    lim2 = 1.0 / (hidden ** 0.5)
    w1 = jax.random.uniform(k1, (n_embd, hidden), dtype, -lim1, lim1)
    b1 = jax.random.uniform(k2, (hidden,), dtype, -lim1, lim1)
    w2 = jax.random.uniform(k3, (hidden, n_embd), dtype, -lim2, lim2)
    b2 = jax.random.uniform(k4, (n_embd,), dtype, -lim2, lim2)
    return w1, b1, w2, b2


if __name__ == "__main__":
    key = jax.random.PRNGKey(0)
    kx, kp = jax.random.split(key)

    B, T = 2, 8   # small shapes; n_embd fixed at 128 by the module
    x = jax.random.normal(kx, (B, T, N_EMBD), jnp.float32)
    w1, b1, w2, b2 = init_params(kp)

    y = feed_forward(x, w1, b1, w2, b2)
    y = jax.block_until_ready(y)

    # sanity check against a pure-JAX f32 reference (eval-mode dropout == identity);
    # tolerance is loose because the kernel computes in bf16 with f32 accumulation.
    ref = jnp.maximum(x @ w1 + b1, 0.0) @ w2 + b2
    assert y.shape == (B, T, N_EMBD)
    assert jnp.allclose(y, ref, atol=3e-2, rtol=3e-2)

    # exercise the ragged-M path (zero padding + >=2 grid steps)
    B2, T2 = 3, 7
    x2 = jax.random.normal(kx, (B2, T2, N_EMBD), jnp.float32)
    y2 = jax.block_until_ready(feed_forward(x2, w1, b1, w2, b2))
    ref2 = jnp.maximum(x2 @ w1 + b1, 0.0) @ w2 + b2
    assert jnp.allclose(y2, ref2, atol=3e-2, rtol=3e-2)

    print("KERNEL_OK")
</pallas_src>

<mosaic_0001>
module attributes {stable_mosaic.version = 11 : i64} {
  func.func @ffn_kernel(%arg0: i32, %arg1: memref<16x128xbf16, #tpu.memory_space<vmem>>, %arg2: memref<128x512xbf16, #tpu.memory_space<vmem>>, %arg3: memref<1x512xf32, #tpu.memory_space<vmem>>, %arg4: memref<512x128xbf16, #tpu.memory_space<vmem>>, %arg5: memref<1x128xf32, #tpu.memory_space<vmem>>, %arg6: memref<16x128xf32, #tpu.memory_space<vmem>>) attributes {dimension_semantics = [#tpu.dimension_semantics<parallel>], iteration_bounds = array<i64: 1>, scalar_prefetch = 0 : i64, scratch_operands = 0 : i64, tpu.core_type = #tpu.core_type<tc>, window_params = [{transform_indices = @transform_0, window_bounds = array<i64: 16, 128>}, {pipeline_mode = #tpu.pipeline_mode<synchronous>, transform_indices = @transform_1, window_bounds = array<i64: 128, 512>}, {pipeline_mode = #tpu.pipeline_mode<synchronous>, transform_indices = @transform_2, window_bounds = array<i64: 1, 512>}, {pipeline_mode = #tpu.pipeline_mode<synchronous>, transform_indices = @transform_3, window_bounds = array<i64: 512, 128>}, {pipeline_mode = #tpu.pipeline_mode<synchronous>, transform_indices = @transform_4, window_bounds = array<i64: 1, 128>}, {transform_indices = @transform_5, window_bounds = array<i64: 16, 128>}]} {
    %c0 = arith.constant 0 : index
    %c0_0 = arith.constant 0 : index
    %0 = vector.load %arg1[%c0, %c0_0] : memref<16x128xbf16, #tpu.memory_space<vmem>>, vector<16x128xbf16>
    %c0_1 = arith.constant 0 : index
    %c0_2 = arith.constant 0 : index
    %1 = vector.load %arg3[%c0_1, %c0_2] : memref<1x512xf32, #tpu.memory_space<vmem>>, vector<1x512xf32>
    %c0_3 = arith.constant 0 : index
    %c0_4 = arith.constant 0 : index
    %2 = vector.load %arg5[%c0_3, %c0_4] : memref<1x128xf32, #tpu.memory_space<vmem>>, vector<1x128xf32>
    %c0_5 = arith.constant 0 : index
    %c0_6 = arith.constant 0 : index
    %3 = vector.load %arg2[%c0_5, %c0_6] : memref<128x512xbf16, #tpu.memory_space<vmem>>, vector<128x512xbf16>
    %cst = arith.constant dense<0.000000e+00> : vector<16x512xf32>
    %4 = tpu.matmul %0, %3, %cst {dimension_numbers = #tpu.dot_dimension_numbers<[1], [0], [0], [1], [0, 0, 1, 1], [], []>} : vector<16x128xbf16>, vector<128x512xbf16>, vector<16x512xf32> -> vector<16x512xf32>
    %5 = vector.broadcast %1 : vector<1x512xf32> to vector<16x512xf32>
    %6 = arith.addf %4, %5 : vector<16x512xf32>
    %cst_7 = arith.constant 0.000000e+00 : f32
    %7 = vector.broadcast %cst_7 : f32 to vector<16x512xf32>
    %8 = arith.maximumf %6, %7 : vector<16x512xf32>
    %9 = arith.truncf %8 : vector<16x512xf32> to vector<16x512xbf16>
    %c0_8 = arith.constant 0 : index
    %c0_9 = arith.constant 0 : index
    %10 = vector.load %arg4[%c0_8, %c0_9] : memref<512x128xbf16, #tpu.memory_space<vmem>>, vector<512x128xbf16>
    %cst_10 = arith.constant dense<0.000000e+00> : vector<16x128xf32>
    %11 = tpu.matmul %9, %10, %cst_10 {dimension_numbers = #tpu.dot_dimension_numbers<[1], [0], [0], [1], [0, 0, 1, 1], [], []>} : vector<16x512xbf16>, vector<512x128xbf16>, vector<16x128xf32> -> vector<16x128xf32>
    %12 = vector.broadcast %2 : vector<1x128xf32> to vector<16x128xf32>
    %13 = arith.addf %11, %12 : vector<16x128xf32>
    %c0_11 = arith.constant 0 : index
    %c0_12 = arith.constant 0 : index
    %14 = vector.load %arg6[%c0_11, %c0_12] : memref<16x128xf32, #tpu.memory_space<vmem>>, vector<16x128xf32>
    tpu.vector_store %arg6[%c0_11, %c0_12], %13 {strides = array<i32>} : memref<16x128xf32, #tpu.memory_space<vmem>>, vector<16x128xf32>,
    return
  }
  func.func @transform_0(%arg0: i32) -> (i32, i32) {
    %c0_i32 = arith.constant 0 : i32
    %c0_i32_0 = arith.constant 0 : i32
    return %arg0, %c0_i32 : i32, i32
  }
  func.func @transform_1(%arg0: i32) -> (i32, i32) {
    %c0_i32 = arith.constant 0 : i32
    %c0_i32_0 = arith.constant 0 : i32
    %c0_i32_1 = arith.constant 0 : i32
    return %c0_i32, %c0_i32_0 : i32, i32
  }
  func.func @transform_2(%arg0: i32) -> (i32, i32) {
    %c0_i32 = arith.constant 0 : i32
    %c0_i32_0 = arith.constant 0 : i32
    %c0_i32_1 = arith.constant 0 : i32
    return %c0_i32, %c0_i32_0 : i32, i32
  }
  func.func @transform_3(%arg0: i32) -> (i32, i32) {
    %c0_i32 = arith.constant 0 : i32
    %c0_i32_0 = arith.constant 0 : i32
    %c0_i32_1 = arith.constant 0 : i32
    return %c0_i32, %c0_i32_0 : i32, i32
  }
  func.func @transform_4(%arg0: i32) -> (i32, i32) {
    %c0_i32 = arith.constant 0 : i32
    %c0_i32_0 = arith.constant 0 : i32
    %c0_i32_1 = arith.constant 0 : i32
    return %c0_i32, %c0_i32_0 : i32, i32
  }
  func.func @transform_5(%arg0: i32) -> (i32, i32) {
    %c0_i32 = arith.constant 0 : i32
    %c0_i32_0 = arith.constant 0 : i32
    return %arg0, %c0_i32 : i32, i32
  }
}

module attributes {stable_mosaic.version = 11 : i64} {
  func.func @ffn_kernel(%arg0: i32, %arg1: memref<16x128xbf16, #tpu.memory_space<vmem>>, %arg2: memref<128x512xbf16, #tpu.memory_space<vmem>>, %arg3: memref<1x512xf32, #tpu.memory_space<vmem>>, %arg4: memref<512x128xbf16, #tpu.memory_space<vmem>>, %arg5: memref<1x128xf32, #tpu.memory_space<vmem>>, %arg6: memref<16x128xf32, #tpu.memory_space<vmem>>) attributes {dimension_semantics = [#tpu.dimension_semantics<parallel>], iteration_bounds = array<i64: 1>, scalar_prefetch = 0 : i64, scratch_operands = 0 : i64, tpu.core_type = #tpu.core_type<tc>, window_params = [{transform_indices = @transform_0, window_bounds = array<i64: 16, 128>}, {pipeline_mode = #tpu.pipeline_mode<synchronous>, transform_indices = @transform_1, window_bounds = array<i64: 128, 512>}, {pipeline_mode = #tpu.pipeline_mode<synchronous>, transform_indices = @transform_2, window_bounds = array<i64: 1, 512>}, {pipeline_mode = #tpu.pipeline_mode<synchronous>, transform_indices = @transform_3, window_bounds = array<i64: 512, 128>}, {pipeline_mode = #tpu.pipeline_mode<synchronous>, transform_indices = @transform_4, window_bounds = array<i64: 1, 128>}, {transform_indices = @transform_5, window_bounds = array<i64: 16, 128>}]} {
    %c0 = arith.constant 0 : index
    %c0_0 = arith.constant 0 : index
    %0 = vector.load %arg1[%c0, %c0_0] : memref<16x128xbf16, #tpu.memory_space<vmem>>, vector<16x128xbf16>
    %c0_1 = arith.constant 0 : index
    %c0_2 = arith.constant 0 : index
    %1 = vector.load %arg3[%c0_1, %c0_2] : memref<1x512xf32, #tpu.memory_space<vmem>>, vector<1x512xf32>
    %c0_3 = arith.constant 0 : index
    %c0_4 = arith.constant 0 : index
    %2 = vector.load %arg5[%c0_3, %c0_4] : memref<1x128xf32, #tpu.memory_space<vmem>>, vector<1x128xf32>
    %c0_5 = arith.constant 0 : index
    %c0_6 = arith.constant 0 : index
    %3 = vector.load %arg2[%c0_5, %c0_6] : memref<128x512xbf16, #tpu.memory_space<vmem>>, vector<128x512xbf16>
    %cst = arith.constant dense<0.000000e+00> : vector<16x512xf32>
    %4 = tpu.matmul %0, %3, %cst {dimension_numbers = #tpu.dot_dimension_numbers<[1], [0], [0], [1], [0, 0, 1, 1], [], []>} : vector<16x128xbf16>, vector<128x512xbf16>, vector<16x512xf32> -> vector<16x512xf32>
    %5 = vector.broadcast %1 : vector<1x512xf32> to vector<16x512xf32>
    %6 = arith.addf %4, %5 : vector<16x512xf32>
    %cst_7 = arith.constant 0.000000e+00 : f32
    %7 = vector.broadcast %cst_7 : f32 to vector<16x512xf32>
    %8 = arith.maximumf %6, %7 : vector<16x512xf32>
    %9 = arith.truncf %8 : vector<16x512xf32> to vector<16x512xbf16>
    %c0_8 = arith.constant 0 : index
    %c0_9 = arith.constant 0 : index
    %10 = vector.load %arg4[%c0_8, %c0_9] : memref<512x128xbf16, #tpu.memory_space<vmem>>, vector<512x128xbf16>
    %cst_10 = arith.constant dense<0.000000e+00> : vector<16x128xf32>
    %11 = tpu.matmul %9, %10, %cst_10 {dimension_numbers = #tpu.dot_dimension_numbers<[1], [0], [0], [1], [0, 0, 1, 1], [], []>} : vector<16x512xbf16>, vector<512x128xbf16>, vector<16x128xf32> -> vector<16x128xf32>
    %12 = vector.broadcast %2 : vector<1x128xf32> to vector<16x128xf32>
    %13 = arith.addf %11, %12 : vector<16x128xf32>
    %c0_11 = arith.constant 0 : index
    %c0_12 = arith.constant 0 : index
    %14 = vector.load %arg6[%c0_11, %c0_12] : memref<16x128xf32, #tpu.memory_space<vmem>>, vector<16x128xf32>
    tpu.vector_store %arg6[%c0_11, %c0_12], %13 {strides = array<i32>} : memref<16x128xf32, #tpu.memory_space<vmem>>, vector<16x128xf32>,
    return
  }
  func.func @transform_0(%arg0: i32) -> (i32, i32) {
    %c0_i32 = arith.constant 0 : i32
    %c0_i32_0 = arith.constant 0 : i32
    return %arg0, %c0_i32 : i32, i32
  }
  func.func @transform_1(%arg0: i32) -> (i32, i32) {
    %c0_i32 = arith.constant 0 : i32
    %c0_i32_0 = arith.constant 0 : i32
    %c0_i32_1 = arith.constant 0 : i32
    return %c0_i32, %c0_i32_0 : i32, i32
  }
  func.func @transform_2(%arg0: i32) -> (i32, i32) {
    %c0_i32 = arith.constant 0 : i32
    %c0_i32_0 = arith.constant 0 : i32
    %c0_i32_1 = arith.constant 0 : i32
    return %c0_i32, %c0_i32_0 : i32, i32
  }
  func.func @transform_3(%arg0: i32) -> (i32, i32) {
    %c0_i32 = arith.constant 0 : i32
    %c0_i32_0 = arith.constant 0 : i32
    %c0_i32_1 = arith.constant 0 : i32
    return %c0_i32, %c0_i32_0 : i32, i32
  }
  func.func @transform_4(%arg0: i32) -> (i32, i32) {
    %c0_i32 = arith.constant 0 : i32
    %c0_i32_0 = arith.constant 0 : i32
    %c0_i32_1 = arith.constant 0 : i32
    return %c0_i32, %c0_i32_0 : i32, i32
  }
  func.func @transform_5(%arg0: i32) -> (i32, i32) {
    %c0_i32 = arith.constant 0 : i32
    %c0_i32_0 = arith.constant 0 : i32
    return %arg0, %c0_i32 : i32, i32
  }
}

</mosaic_0001>

<bundles_post_ra>
// kernel: tpu_custom_call.1
= control target key start
LH: loop header
LB: loop body
LE: loop exit
PB: predicated region body
PF: predicated region fallthrough
CT: control target
= control target key end

     0   :  { %10 = vsyncpa [#allocation3], 0  ;;  %s1132_s0 = inlined_call_operand.hbm [shape: bf16[16,128], index: 0, kind: input, shape index: {}]   ;;  %s1133_s1 = inlined_call_operand.hbm [shape: bf16[128,512], index: 1, kind: input, shape index: {}]   ;;  %s1134_s2 = inlined_call_operand.hbm [shape: f32[1,512], index: 2, kind: input, shape index: {}]   ;;  %s1135_s3 = inlined_call_operand.hbm [shape: bf16[512,128], index: 3, kind: input, shape index: {}]   ;;  %s1136_s4 = inlined_call_operand.vmem [shape: f32[1,128], index: 4, kind: input, shape index: {}]   ;;  %s1137_s5 = inlined_call_operand.hbm [shape: f32[16,128], index: 5, kind: output, shape index: {}]  }
   0x1   :  { %11 = vsyncpa [#allocation6], 0 }
   0x2   :  { %12 = vsyncpa [#allocation9], 0 }
   0x3   :  { %13 = vsyncpa [#allocation4], 0  ;;  %s1072_s18 = smov [#allocation5]  }
   0x4   :  { %s31_s19 = sshll.u32 %s1072_s18, 4  ;;  %s32_s19 = int_to_ptr.vmem [resolvable:$true] %s31_s19 }
   0x5   :  { %s972_s20 = scalar_lea.vmem %s32_s19, 4096  ;;  %p977_p1 = scmp.lt.s32.totalorder %s32_s19, %s32_s19 }
   0x6   :  { %p973_p0 = scmp.ne.s32.totalorder %s32_s19, %s972_s20  ;;  %p978_p2 = scmp.lt.s32.totalorder %s972_s20, %s972_s20 }
   0x8   :  { %p979_p3 = por %p978_p2, %p977_p1 }
   0xa   :  { %p980_p4 = pnand %p979_p3, %p973_p0 }
   0xc   :  { %983 = shalt.err (!%p980_p4)
}
   0xd   :  { %s1073_s21 = smov 256   ;;  %s1074_s22 = smov 16  }
   0xe   :  { %37 = dma.hbm_to_vmem [thread:$0]  %s1133_s1, 4096, %s32_s19, [#allocation6], %s1073_s21, %s1073_s21, %s1074_s22  }
   0xf   :  { %s1075_s25 = smov [#allocation2]  }
  0x10   :  { %s19_s26 = sshll.u32 %s1075_s25, 4  ;;  %s20_s26 = int_to_ptr.vmem [resolvable:$true] %s19_s26 }
  0x11   :  { %s992_s27 = scalar_lea.vmem %s20_s26, 128  ;;  %p997_p6 = scmp.lt.s32.totalorder %s20_s26, %s20_s26 }
  0x12   :  { %p993_p5 = scmp.ne.s32.totalorder %s20_s26, %s992_s27  ;;  %p998_p7 = scmp.lt.s32.totalorder %s992_s27, %s992_s27 }
  0x14   :  { %p999_p8 = por %p998_p7, %p997_p6 }
  0x16   :  { %p1000_p9 = pnand %p999_p8, %p993_p5 }
  0x18   :  { %1003 = shalt.err (!%p1000_p9)
}
  0x19   :  { %s1076_s28 = smov 64   ;;  %s1077_s29 = smov 4  }
  0x1a   :  { %25 = dma.hbm_to_vmem [thread:$0]  %s1132_s0, 128, %s20_s26, [#allocation3], %s1076_s28, %s1076_s28, %s1077_s29  }
  0x1b   :  { %s1078_s7 = smov [#allocation7]   ;;  %s1079_s9 = smov [#allocation8]  }
  0x1c   :  { %s44_s8 = sshll.u32 %s1078_s7, 4  ;;  %s53_s1 = sshll.u32 %s1079_s9, 4  ;;  %s45_s8 = int_to_ptr.vmem [resolvable:$true] %s44_s8  ;;  %s54_s1 = int_to_ptr.vmem [resolvable:$true] %s53_s1 }
  0x1d   :  { %s1012_s10 = scalar_lea.vmem %s45_s8, 64  ;;  %p1017_p11 = scmp.lt.s32.totalorder %s45_s8, %s45_s8 }
  0x1e   :  { %p1013_p10 = scmp.ne.s32.totalorder %s45_s8, %s1012_s10  ;;  %p1018_p12 = scmp.lt.s32.totalorder %s1012_s10, %s1012_s10 }
  0x20   :  { %p1019_p13 = por %p1018_p12, %p1017_p11 }
  0x22   :  { %p1020_p0 = pnand %p1019_p13, %p1013_p10 }
  0x24   :  { %1023 = shalt.err (!%p1020_p0)
}
  0x25   :  { %47 = dma.hbm_to_vmem [thread:$0]  %s1134_s2, 64, %s45_s8, [#allocation6]  }
  0x26   :  { %s1032_s13 = scalar_lea.vmem %s54_s1, 4096  ;;  %p1037_p2 = scmp.lt.s32.totalorder %s54_s1, %s54_s1 }
  0x27   :  { %p1033_p1 = scmp.ne.s32.totalorder %s54_s1, %s1032_s13  ;;  %p1038_p3 = scmp.lt.s32.totalorder %s1032_s13, %s1032_s13 }
  0x29   :  { %p1039_p4 = por %p1038_p3, %p1037_p2 }
  0x2b   :  { %p1040_p5 = pnand %p1039_p4, %p1033_p1 }
  0x2d   :  { %1043 = shalt.err (!%p1040_p5)
}
  0x2e   :  { %59 = dma.hbm_to_vmem [thread:$0]  %s1135_s3, 4096, %s54_s1, [#allocation9], %s1076_s28, %s1076_s28, %s1077_s29  }
  0x2f   :  { %1064 = dma.done.wait [#allocation3], 128  }
  0x30   :  { %1065 = vsyncadd [#allocation3], 4294967168 }
  0x31   :  { %1066 = dma.done.wait [#allocation6], 4160  }
  0x32   :  { %1067 = vsyncadd [#allocation6], 4294963136 }
  0x33   :  { %1068 = dma.done.wait [#allocation9], 4096  }
  0x34   :  { %1069 = vsyncadd [#allocation9], 4294963200  ;;  %v1080_v0 = vmov 0   ;;  %v883_v1 = vld [vmem:[#allocation5 + $0xe4] ss:$16 sps:$4 sm:$0xff]   ;;  %v932_v33 = vld [vmem:[#allocation8 + $0x78] sm:$0xff]  }
  0x35   :  { %330 = vmatprep.mubr.bf16.mxu0 %v1080_v0  ;;  %373 = vmatprep.mubr.bf16.mxu1 %v1080_v0  ;;  %v885_v2 = vld [vmem:[#allocation5 + $0xec] ss:$16 sps:$4 sm:$0xff]   ;;  %v887_v3 = vld [vmem:[#allocation5 + $0xe0] ss:$16 sps:$4 sm:$0xff]   ;;  %v888_v4 = vld [vmem:[#allocation5 + $0xe8] ss:$16 sps:$4 sm:$0xff]  }
  0x36   :  { %298 = vmatprep.subr.bf16.mxu0 %v883_v1  ;;  %341 = vmatprep.subr.bf16.mxu1 %v885_v2  ;;  %v889_v5 = vld [vmem:[#allocation5 + $0xc4] ss:$16 sps:$4 sm:$0xff]   ;;  %v891_v6 = vld [vmem:[#allocation5 + $0xcc] ss:$16 sps:$4 sm:$0xff]   ;;  %v893_v7 = vld [vmem:[#allocation5 + $0xc0] ss:$16 sps:$4 sm:$0xff]   ;;  %v112_v2 = vlaneseq }
  0x37   :  { %299 = vmatpush1.bf16.msra.mxu0 %v887_v3  ;;  %342 = vmatpush1.bf16.msra.mxu1 %v888_v4  ;;  %v894_v8 = vld [vmem:[#allocation5 + $0xc8] ss:$16 sps:$4 sm:$0xff]   ;;  %v895_v9 = vld [vmem:[#allocation5 + $0xa4] ss:$16 sps:$4 sm:$0xff]   ;;  %v897_v10 = vld [vmem:[#allocation5 + $0xac] ss:$16 sps:$4 sm:$0xff]  }
  0x38   :  { %300 = vmatprep.subr.bf16.mxu0 %v889_v5  ;;  %343 = vmatprep.subr.bf16.mxu1 %v891_v6  ;;  %v899_v11 = vld [vmem:[#allocation5 + $0xa0] ss:$16 sps:$4 sm:$0xff]   ;;  %v900_v12 = vld [vmem:[#allocation5 + $0xa8] ss:$16 sps:$4 sm:$0xff]   ;;  %v901_v13 = vld [vmem:[#allocation5 + $0x84] ss:$16 sps:$4 sm:$0xff]  }
  0x39   :  { %v903_v14 = vld [vmem:[#allocation5 + $0x8c] ss:$16 sps:$4 sm:$0xff]   ;;  %v905_v15 = vld [vmem:[#allocation5 + $0x80] ss:$16 sps:$4 sm:$0xff]   ;;  %v906_v16 = vld [vmem:[#allocation5 + $0x88] ss:$16 sps:$4 sm:$0xff]  }
  0x3a   :  { %v907_v17 = vld [vmem:[#allocation5 + $0x64] ss:$16 sps:$4 sm:$0xff]   ;;  %v909_v18 = vld [vmem:[#allocation5 + $0x6c] ss:$16 sps:$4 sm:$0xff]   ;;  %v911_v19 = vld [vmem:[#allocation5 + $0x60] ss:$16 sps:$4 sm:$0xff]  }
  0x3b   :  { %301 = vmatpush1.bf16.msra.mxu0 %v893_v7  ;;  %344 = vmatpush1.bf16.msra.mxu1 %v894_v8  ;;  %v912_v20 = vld [vmem:[#allocation5 + $0x68] ss:$16 sps:$4 sm:$0xff]   ;;  %v913_v21 = vld [vmem:[#allocation5 + $0x44] ss:$16 sps:$4 sm:$0xff]   ;;  %v915_v22 = vld [vmem:[#allocation5 + $0x4c] ss:$16 sps:$4 sm:$0xff]  }
  0x3c   :  { %302 = vmatprep.subr.bf16.mxu0 %v895_v9  ;;  %345 = vmatprep.subr.bf16.mxu1 %v897_v10  ;;  %v917_v23 = vld [vmem:[#allocation5 + $0x40] ss:$16 sps:$4 sm:$0xff]   ;;  %v918_v24 = vld [vmem:[#allocation5 + $0x48] ss:$16 sps:$4 sm:$0xff]   ;;  %v919_v25 = vld [vmem:[#allocation5 + $0x24] ss:$16 sps:$4 sm:$0xff]  }
  0x3d   :  { %v921_v26 = vld [vmem:[#allocation5 + $0x2c] ss:$16 sps:$4 sm:$0xff]   ;;  %v923_v27 = vld [vmem:[#allocation5 + $0x20] ss:$16 sps:$4 sm:$0xff]   ;;  %v924_v28 = vld [vmem:[#allocation5 + $0x28] ss:$16 sps:$4 sm:$0xff]  }
  0x3e   :  { %v925_v29 = vld [vmem:[#allocation5 + $0x4] ss:$16 sps:$4 sm:$0xff]   ;;  %v927_v30 = vld [vmem:[#allocation5 + $0xc] ss:$16 sps:$4 sm:$0xff]   ;;  %v929_v31 = vld [vmem:[#allocation5] ss:$16 sps:$4 sm:$0xff]  }
  0x3f   :  { %303 = vmatpush1.bf16.msra.mxu0 %v899_v11  ;;  %346 = vmatpush1.bf16.msra.mxu1 %v900_v12  ;;  %v930_v32 = vld [vmem:[#allocation5 + $0x8] ss:$16 sps:$4 sm:$0xff]   ;;  %v933_v35 = vld [vmem:[#allocation8 + $0xf8] sm:$0xff]   ;;  %v940_v42 = vld [vmem:[#allocation8 + $0x68] sm:$0xff]   ;;  %v113_v3 = vshrl.u32 %v112_v2, 7  ;;  %s1081_s15 = smov [#allocation10]  }
  0x40   :  { %304 = vmatprep.subr.bf16.mxu0 %v901_v13  ;;  %347 = vmatprep.subr.bf16.mxu1 %v903_v14  ;;  %v931_v34 = vld [vmem:[#allocation2] sm:$0xff]   ;;  %v941_v43 = vld [vmem:[#allocation8 + $0xe8] sm:$0xff]   ;;  %v944_v46 = vld [vmem:[#allocation8 + $0x60] sm:$0xff]   ;;  %s747_s16 = sshll.u32 %s1081_s15, 4  ;;  %s748_s16 = int_to_ptr.vmem [resolvable:$true] %s747_s16 }
  0x41   :  { %v934_v36 = vld [vmem:[#allocation8 + $0x38] sm:$0xff]   ;;  %v936_v38 = vld [vmem:[#allocation8 + $0x70] sm:$0xff]   ;;  %v942_v44 = vld [vmem:[#allocation8 + $0x28] sm:$0xff]   ;;  %v118_v4 = vsub.s32 1, %v113_v3  ;;  %v126_v5 = vsub.s32 3, %v113_v3  ;;  %v114_v6 = vsub.s32 0, %v113_v3  ;;  %p1049_p7 = scmp.lt.s32.totalorder %s748_s16, %s748_s16 }
  0x42   :  { %v935_v37 = vld [vmem:[#allocation8 + $0xb8] sm:$0xff]   ;;  %v937_v39 = vld [vmem:[#allocation8 + $0xf0] sm:$0xff]   ;;  %v943_v45 = vld [vmem:[#allocation8 + $0xa8] sm:$0xff]   ;;  %v122_v7 = vsub.s32 2, %v113_v3 }
  0x43   :  { %305 = vmatpush1.bf16.msra.mxu0 %v905_v15  ;;  %348 = vmatpush1.bf16.msra.mxu1 %v906_v16  ;;  %v938_v40 = vld [vmem:[#allocation8 + $0x30] sm:$0xff]   ;;  %v945_v47 = vld [vmem:[#allocation8 + $0xe0] sm:$0xff]   ;;  %v948_v50 = vld [vmem:[#allocation8 + $0x58] sm:$0xff]  }
  0x44   :  { %306 = vmatprep.subr.bf16.mxu0 %v907_v17  ;;  %349 = vmatprep.subr.bf16.mxu1 %v909_v18  ;;  %v939_v41 = vld [vmem:[#allocation8 + $0xb0] sm:$0xff]   ;;  %v946_v48 = vld [vmem:[#allocation8 + $0x20] sm:$0xff]   ;;  %v949_v51 = vld [vmem:[#allocation8 + $0xd8] sm:$0xff]  }
  0x45   :  { %v947_v49 = vld [vmem:[#allocation8 + $0xa0] sm:$0xff]   ;;  %v950_v52 = vld [vmem:[#allocation8 + $0x18] sm:$0xff]   ;;  %v952_v54 = vld [vmem:[#allocation8 + $0x50] sm:$0xff]  }
  0x46   :  { %v951_v53 = vld [vmem:[#allocation8 + $0x98] sm:$0xff]   ;;  %v953_v55 = vld [vmem:[#allocation8 + $0xd0] sm:$0xff]   ;;  %v956_v58 = vld [vmem:[#allocation8 + $0x48] sm:$0xff]  }
  0x47   :  { %307 = vmatpush1.bf16.msra.mxu0 %v911_v19  ;;  %350 = vmatpush1.bf16.msra.mxu1 %v912_v20  ;;  %v954_v56 = vld [vmem:[#allocation8 + $0x10] sm:$0xff]   ;;  %v957_v59 = vld [vmem:[#allocation8 + $0xc8] sm:$0xff]   ;;  %v960_v62 = vld [vmem:[#allocation8 + $0x40] sm:$0xff]  }
  0x48   :  { %308 = vmatprep.subr.bf16.mxu0 %v913_v21  ;;  %351 = vmatprep.subr.bf16.mxu1 %v915_v22  ;;  %v955_v57 = vld [vmem:[#allocation8 + $0x90] sm:$0xff]   ;;  %v958_v60 = vld [vmem:[#allocation8 + $0x8] sm:$0xff]   ;;  %v961_v63 = vld [vmem:[#allocation8 + $0xc0] sm:$0xff]  }
  0x49   :  { %v959_v61 = vld [vmem:[#allocation8 + $0x88] sm:$0xff]   ;;  %v962_v0 = vld [vmem:[#allocation8] sm:$0xff]   ;;  %v77_v8 = vld [vmem:[#allocation7] sm:$0xf] }
  0x4a   :  { %v963_v1 = vld [vmem:[#allocation8 + $0x80] sm:$0xff]   ;;  %v119_v11 = vrot.slane %v77_v8, %v118_v4  ;;  %v127_v12 = vrot.slane %v77_v8, %v126_v5  ;;  %v115_v13 = vrot.slane %v77_v8, %v114_v6  ;;  %v123_v14 = vrot.slane %v77_v8, %v122_v7 }
  0x4b   :  { %309 = vmatpush1.bf16.msra.mxu0 %v917_v23  ;;  %352 = vmatpush1.bf16.msra.mxu1 %v918_v24 }
  0x4c   :  { %310 = vmatprep.subr.bf16.mxu0 %v919_v25  ;;  %353 = vmatprep.subr.bf16.mxu1 %v921_v26 }
  0x4f   :  { %311 = vmatpush1.bf16.msra.mxu0 %v923_v27  ;;  %354 = vmatpush1.bf16.msra.mxu1 %v924_v28 }
  0x50   :  { %312 = vmatprep.subr.bf16.mxu0 %v925_v29  ;;  %355 = vmatprep.subr.bf16.mxu1 %v927_v30 }
  0x53   :  { %313 = vmatpush1.bf16.msra.mxu0 %v929_v31  ;;  %356 = vmatpush1.bf16.msra.mxu1 %v930_v32 }
  0x54   :  { %827 = vmatprep.subr.bf16.mxu0 %v932_v33  ;;  %849 = vmatprep.subr.bf16.mxu1 %v933_v35 }
  0x56   :  { %331 = vmatmul.mubr.bf16.vlgmr.msra.gmra.mxu0 %v931_v34  ;;  %374 = vmatmul.mubr.bf16.vlgmr.msra.gmra.mxu1 %v931_v34 }
  0x57   :  { %828 = vmatpush3.bf16.msra.mxu0 %v934_v36  ;;  %850 = vmatpush3.bf16.msra.mxu1 %v935_v37 }
  0x58   :  { %829 = vmatprep.subr.bf16.mxu0 %v936_v38  ;;  %851 = vmatprep.subr.bf16.mxu1 %v937_v39 }
  0x5b   :  { %830 = vmatpush3.bf16.msra.mxu0 %v938_v40  ;;  %852 = vmatpush3.bf16.msra.mxu1 %v939_v41 }
  0x5c   :  { %831 = vmatprep.subr.bf16.mxu0 %v940_v42  ;;  %853 = vmatprep.subr.bf16.mxu1 %v941_v43  ;;  %v794_v43 = vld [vmem:[%s1136_s4] ss:$0 sm:$0xff]  ;;  %s1044_s4 = scalar_lea.vmem %s748_s16, 256 }
  0x5d   :  { %p1045_p6 = scmp.ne.s32.totalorder %s748_s16, %s1044_s4  ;;  %p1050_p8 = scmp.lt.s32.totalorder %s1044_s4, %s1044_s4 }
  0x5f   :  { %832 = vmatpush3.bf16.msra.mxu0 %v942_v44  ;;  %854 = vmatpush3.bf16.msra.mxu1 %v943_v45  ;;  %p1051_p9 = por %p1050_p8, %p1049_p7 }
  0x60   :  { %833 = vmatprep.subr.bf16.mxu0 %v944_v46  ;;  %855 = vmatprep.subr.bf16.mxu1 %v945_v47 }
  0x61   :  { %p1052_p10 = pnand %p1051_p9, %p1045_p6 }
  0x63   :  { %834 = vmatpush3.bf16.msra.mxu0 %v946_v48  ;;  %856 = vmatpush3.bf16.msra.mxu1 %v947_v49 }
  0x64   :  { %835 = vmatprep.subr.bf16.mxu0 %v948_v50  ;;  %857 = vmatprep.subr.bf16.mxu1 %v949_v51 }
  0x67   :  { %836 = vmatpush3.bf16.msra.mxu0 %v950_v52  ;;  %858 = vmatpush3.bf16.msra.mxu1 %v951_v53 }
  0x68   :  { %837 = vmatprep.subr.bf16.mxu0 %v952_v54  ;;  %859 = vmatprep.subr.bf16.mxu1 %v953_v55 }
  0x6b   :  { %838 = vmatpush3.bf16.msra.mxu0 %v954_v56  ;;  %860 = vmatpush3.bf16.msra.mxu1 %v955_v57 }
  0x6c   :  { %839 = vmatprep.subr.bf16.mxu0 %v956_v58  ;;  %861 = vmatprep.subr.bf16.mxu1 %v957_v59 }
  0x6f   :  { %840 = vmatpush3.bf16.msra.mxu0 %v958_v60  ;;  %862 = vmatpush3.bf16.msra.mxu1 %v959_v61 }
  0x70   :  { %841 = vmatprep.subr.bf16.mxu0 %v960_v62  ;;  %863 = vmatprep.subr.bf16.mxu1 %v961_v63 }
  0x73   :  { %842 = vmatpush3.bf16.msra.mxu0 %v962_v0  ;;  %864 = vmatpush3.bf16.msra.mxu1 %v963_v1 }
 0x116   :  { %v332_v9 = vpop.f32.mrf.mxu0  ;;  %v375_v10 = vpop.f32.mrf.mxu1 }
 0x117   :  { %v333_v23 = vadd.f32 %v332_v9, %v115_v13  ;;  %v376_v24 = vadd.f32 %v375_v10, %v123_v14 }
 0x118   :  { %v334_v15 = vpop.f32.mrf.mxu0  ;;  %v377_v16 = vpop.f32.mrf.mxu1 }
 0x119   :  { %v335_v19 = vadd.f32 %v334_v15, %v119_v11  ;;  %v378_v20 = vadd.f32 %v377_v16, %v127_v12  ;;  %v384_v35 = vmax.f32 %v333_v23, 0.0  ;;  %v386_v36 = vmax.f32 %v376_v24, 0.0 }
 0x11a   :  { %v336_v17 = vpop.f32.mrf.mxu0  ;;  %v379_v18 = vpop.f32.mrf.mxu1 }
 0x11b   :  { %v337_v21 = vadd.f32 %v336_v17, %v115_v13  ;;  %v380_v22 = vadd.f32 %v379_v18, %v123_v14  ;;  %v385_v31 = vmax.f32 %v335_v19, 0.0  ;;  %v387_v32 = vmax.f32 %v378_v20, 0.0 }
 0x11c   :  { %v338_v25 = vpop.f32.mrf.mxu0  ;;  %v381_v26 = vpop.f32.mrf.mxu1 }
 0x11d   :  { %v339_v27 = vadd.f32 %v338_v25, %v119_v11  ;;  %v382_v28 = vadd.f32 %v381_v26, %v127_v12  ;;  %v388_v29 = vmax.f32 %v337_v21, 0.0  ;;  %v390_v30 = vmax.f32 %v380_v22, 0.0 }
 0x11f   :  { %v389_v33 = vmax.f32 %v339_v27, 0.0  ;;  %v391_v34 = vmax.f32 %v382_v28, 0.0  ;;  %v392_v39 = vpack.c.bf16 %v388_v29, %v384_v35  ;;  %v394_v40 = vpack.c.bf16 %v390_v30, %v386_v36 }
 0x121   :  { %v393_v37 = vpack.c.bf16 %v389_v33, %v385_v31  ;;  %v395_v38 = vpack.c.bf16 %v391_v34, %v387_v32 }
 0x123   :  { %690 = vmatprep.mubr.bf16.mxu0 %v393_v37  ;;  %731 = vmatprep.mubr.bf16.mxu1 %v395_v38 }
 0x124   :  { %691 = vmatmul.mubr.bf16.vlgmr.msra.gmra.mxu0 %v392_v39  ;;  %732 = vmatmul.mubr.bf16.vlgmr.msra.gmra.mxu1 %v394_v40 }
 0x1e4   :  { %v843_v41 = vpop.f32.mrf.mxu0  ;;  %v865_v42 = vpop.f32.mrf.mxu1 }
 0x1e6   :  { %v844_v44 = vpop.f32.mrf.mxu0  ;;  %v866_v45 = vpop.f32.mrf.mxu1 }
 0x1e7   :  { %v845_v46 = vadd.f32 %v844_v44, %v843_v41  ;;  %v867_v50 = vadd.f32 %v866_v45, %v865_v42 }
 0x1e8   :  { %v846_v47 = vpop.f32.mrf.mxu0  ;;  %v868_v48 = vpop.f32.mrf.mxu1 }
 0x1e9   :  { %v693_v49 = vadd.f32 %v845_v46, %v794_v43 }
 0x1ea   :  { %v847_v51 = vpop.f32.mrf.mxu0  ;;  %v869_v52 = vpop.f32.mrf.mxu1 }
 0x1eb   :  { %v734_v53 = vadd.f32 %v867_v50, %v693_v49  ;;  %v848_v54 = vadd.f32 %v847_v51, %v846_v47  ;;  %v870_v56 = vadd.f32 %v869_v52, %v868_v48 }
 0x1ed   :  { %740 = vst [vmem:[#allocation10] sm:$0xff] %v734_v53  ;;  %v696_v55 = vadd.f32 %v848_v54, %v794_v43 }
 0x1ef   :  { %v737_v57 = vadd.f32 %v870_v56, %v696_v55 }
 0x1f1   :  { %741 = vst [vmem:[#allocation10 + $0x8] sm:$0xff] %v737_v57 }
 0x1f2   :  { %1055 = shalt.err (!%p1052_p10)
}
 0x1f3   :  { %s1082_s17 = smov 128   ;;  %s1083_s18 = smov 8  }
 0x1f4   :  { %753 = dma.vmem_to_hbm [thread:$0]  %s748_s16, 256, %s1137_s5, [#allocation4], %s1082_s17, %s1082_s17, %s1083_s18  }
 0x1f5   :  { %1070 = dma.done.wait [#allocation4], 256  }
 0x1f6   :  { %1071 = vsyncadd [#allocation4], 4294967040 }
 0x1f7   :  { %757 = vsyncpa [#allocation3], 1 }
 0x1f8   :  { %758 = vsyncpa [#allocation6], 1 }
 0x1f9   :  { %759 = vsyncpa [#allocation9], 1 }
 0x1fa   :  { %760 = vsyncpa [#allocation4], 1 }

// kernel: tpu_custom_call.1
= control target key start
LH: loop header
LB: loop body
LE: loop exit
PB: predicated region body
PF: predicated region fallthrough
CT: control target
= control target key end

     0   :  { %10 = vsyncpa [#allocation3], 0  ;;  %s1132_s0 = inlined_call_operand.hbm [shape: bf16[16,128], index: 0, kind: input, shape index: {}]   ;;  %s1133_s1 = inlined_call_operand.hbm [shape: bf16[128,512], index: 1, kind: input, shape index: {}]   ;;  %s1134_s2 = inlined_call_operand.hbm [shape: f32[1,512], index: 2, kind: input, shape index: {}]   ;;  %s1135_s3 = inlined_call_operand.hbm [shape: bf16[512,128], index: 3, kind: input, shape index: {}]   ;;  %s1136_s4 = inlined_call_operand.vmem [shape: f32[1,128], index: 4, kind: input, shape index: {}]   ;;  %s1137_s5 = inlined_call_operand.hbm [shape: f32[16,128], index: 5, kind: output, shape index: {}]  }
   0x1   :  { %11 = vsyncpa [#allocation6], 0 }
   0x2   :  { %12 = vsyncpa [#allocation9], 0 }
   0x3   :  { %13 = vsyncpa [#allocation4], 0  ;;  %s1072_s18 = smov [#allocation5]  }
   0x4   :  { %s31_s19 = sshll.u32 %s1072_s18, 4  ;;  %s32_s19 = int_to_ptr.vmem [resolvable:$true] %s31_s19 }
   0x5   :  { %s972_s20 = scalar_lea.vmem %s32_s19, 4096  ;;  %p977_p1 = scmp.lt.s32.totalorder %s32_s19, %s32_s19 }
   0x6   :  { %p973_p0 = scmp.ne.s32.totalorder %s32_s19, %s972_s20  ;;  %p978_p2 = scmp.lt.s32.totalorder %s972_s20, %s972_s20 }
   0x8   :  { %p979_p3 = por %p978_p2, %p977_p1 }
   0xa   :  { %p980_p4 = pnand %p979_p3, %p973_p0 }
   0xc   :  { %983 = shalt.err (!%p980_p4)
}
   0xd   :  { %s1073_s21 = smov 256   ;;  %s1074_s22 = smov 16  }
   0xe   :  { %37 = dma.hbm_to_vmem [thread:$0]  %s1133_s1, 4096, %s32_s19, [#allocation6], %s1073_s21, %s1073_s21, %s1074_s22  }
   0xf   :  { %s1075_s25 = smov [#allocation2]  }
  0x10   :  { %s19_s26 = sshll.u32 %s1075_s25, 4  ;;  %s20_s26 = int_to_ptr.vmem [resolvable:$true] %s19_s26 }
  0x11   :  { %s992_s27 = scalar_lea.vmem %s20_s26, 128  ;;  %p997_p6 = scmp.lt.s32.totalorder %s20_s26, %s20_s26 }
  0x12   :  { %p993_p5 = scmp.ne.s32.totalorder %s20_s26, %s992_s27  ;;  %p998_p7 = scmp.lt.s32.totalorder %s992_s27, %s992_s27 }
  0x14   :  { %p999_p8 = por %p998_p7, %p997_p6 }
  0x16   :  { %p1000_p9 = pnand %p999_p8, %p993_p5 }
  0x18   :  { %1003 = shalt.err (!%p1000_p9)
}
  0x19   :  { %s1076_s28 = smov 64   ;;  %s1077_s29 = smov 4  }
  0x1a   :  { %25 = dma.hbm_to_vmem [thread:$0]  %s1132_s0, 128, %s20_s26, [#allocation3], %s1076_s28, %s1076_s28, %s1077_s29  }
  0x1b   :  { %s1078_s7 = smov [#allocation7]   ;;  %s1079_s9 = smov [#allocation8]  }
  0x1c   :  { %s44_s8 = sshll.u32 %s1078_s7, 4  ;;  %s53_s1 = sshll.u32 %s1079_s9, 4  ;;  %s45_s8 = int_to_ptr.vmem [resolvable:$true] %s44_s8  ;;  %s54_s1 = int_to_ptr.vmem [resolvable:$true] %s53_s1 }
  0x1d   :  { %s1012_s10 = scalar_lea.vmem %s45_s8, 64  ;;  %p1017_p11 = scmp.lt.s32.totalorder %s45_s8, %s45_s8 }
  0x1e   :  { %p1013_p10 = scmp.ne.s32.totalorder %s45_s8, %s1012_s10  ;;  %p1018_p12 = scmp.lt.s32.totalorder %s1012_s10, %s1012_s10 }
  0x20   :  { %p1019_p13 = por %p1018_p12, %p1017_p11 }
  0x22   :  { %p1020_p0 = pnand %p1019_p13, %p1013_p10 }
  0x24   :  { %1023 = shalt.err (!%p1020_p0)
}
  0x25   :  { %47 = dma.hbm_to_vmem [thread:$0]  %s1134_s2, 64, %s45_s8, [#allocation6]  }
  0x26   :  { %s1032_s13 = scalar_lea.vmem %s54_s1, 4096  ;;  %p1037_p2 = scmp.lt.s32.totalorder %s54_s1, %s54_s1 }
  0x27   :  { %p1033_p1 = scmp.ne.s32.totalorder %s54_s1, %s1032_s13  ;;  %p1038_p3 = scmp.lt.s32.totalorder %s1032_s13, %s1032_s13 }
  0x29   :  { %p1039_p4 = por %p1038_p3, %p1037_p2 }
  0x2b   :  { %p1040_p5 = pnand %p1039_p4, %p1033_p1 }
  0x2d   :  { %1043 = shalt.err (!%p1040_p5)
}
  0x2e   :  { %59 = dma.hbm_to_vmem [thread:$0]  %s1135_s3, 4096, %s54_s1, [#allocation9], %s1076_s28, %s1076_s28, %s1077_s29  }
  0x2f   :  { %1064 = dma.done.wait [#allocation3], 128  }
  0x30   :  { %1065 = vsyncadd [#allocation3], 4294967168 }
  0x31   :  { %1066 = dma.done.wait [#allocation6], 4160  }
  0x32   :  { %1067 = vsyncadd [#allocation6], 4294963136 }
  0x33   :  { %1068 = dma.done.wait [#allocation9], 4096  }
  0x34   :  { %1069 = vsyncadd [#allocation9], 4294963200  ;;  %v1080_v0 = vmov 0   ;;  %v883_v1 = vld [vmem:[#allocation5 + $0xe4] ss:$16 sps:$4 sm:$0xff]   ;;  %v932_v33 = vld [vmem:[#allocation8 + $0x78] sm:$0xff]  }
  0x35   :  { %330 = vmatprep.mubr.bf16.mxu0 %v1080_v0  ;;  %373 = vmatprep.mubr.bf16.mxu1 %v1080_v0  ;;  %v885_v2 = vld [vmem:[#allocation5 + $0xec] ss:$16 sps:$4 sm:$0xff]   ;;  %v887_v3 = vld [vmem:[#allocation5 + $0xe0] ss:$16 sps:$4 sm:$0xff]   ;;  %v888_v4 = vld [vmem:[#allocation5 + $0xe8] ss:$16 sps:$4 sm:$0xff]  }
  0x36   :  { %298 = vmatprep.subr.bf16.mxu0 %v883_v1  ;;  %341 = vmatprep.subr.bf16.mxu1 %v885_v2  ;;  %v889_v5 = vld [vmem:[#allocation5 + $0xc4] ss:$16 sps:$4 sm:$0xff]   ;;  %v891_v6 = vld [vmem:[#allocation5 + $0xcc] ss:$16 sps:$4 sm:$0xff]   ;;  %v893_v7 = vld [vmem:[#allocation5 + $0xc0] ss:$16 sps:$4 sm:$0xff]   ;;  %v112_v2 = vlaneseq }
  0x37   :  { %299 = vmatpush1.bf16.msra.mxu0 %v887_v3  ;;  %342 = vmatpush1.bf16.msra.mxu1 %v888_v4  ;;  %v894_v8 = vld [vmem:[#allocation5 + $0xc8] ss:$16 sps:$4 sm:$0xff]   ;;  %v895_v9 = vld [vmem:[#allocation5 + $0xa4] ss:$16 sps:$4 sm:$0xff]   ;;  %v897_v10 = vld [vmem:[#allocation5 + $0xac] ss:$16 sps:$4 sm:$0xff]  }
  0x38   :  { %300 = vmatprep.subr.bf16.mxu0 %v889_v5  ;;  %343 = vmatprep.subr.bf16.mxu1 %v891_v6  ;;  %v899_v11 = vld [vmem:[#allocation5 + $0xa0] ss:$16 sps:$4 sm:$0xff]   ;;  %v900_v12 = vld [vmem:[#allocation5 + $0xa8] ss:$16 sps:$4 sm:$0xff]   ;;  %v901_v13 = vld [vmem:[#allocation5 + $0x84] ss:$16 sps:$4 sm:$0xff]  }
  0x39   :  { %v903_v14 = vld [vmem:[#allocation5 + $0x8c] ss:$16 sps:$4 sm:$0xff]   ;;  %v905_v15 = vld [vmem:[#allocation5 + $0x80] ss:$16 sps:$4 sm:$0xff]   ;;  %v906_v16 = vld [vmem:[#allocation5 + $0x88] ss:$16 sps:$4 sm:$0xff]  }
  0x3a   :  { %v907_v17 = vld [vmem:[#allocation5 + $0x64] ss:$16 sps:$4 sm:$0xff]   ;;  %v909_v18 = vld [vmem:[#allocation5 + $0x6c] ss:$16 sps:$4 sm:$0xff]   ;;  %v911_v19 = vld [vmem:[#allocation5 + $0x60] ss:$16 sps:$4 sm:$0xff]  }
  0x3b   :  { %301 = vmatpush1.bf16.msra.mxu0 %v893_v7  ;;  %344 = vmatpush1.bf16.msra.mxu1 %v894_v8  ;;  %v912_v20 = vld [vmem:[#allocation5 + $0x68] ss:$16 sps:$4 sm:$0xff]   ;;  %v913_v21 = vld [vmem:[#allocation5 + $0x44] ss:$16 sps:$4 sm:$0xff]   ;;  %v915_v22 = vld [vmem:[#allocation5 + $0x4c] ss:$16 sps:$4 sm:$0xff]  }
  0x3c   :  { %302 = vmatprep.subr.bf16.mxu0 %v895_v9  ;;  %345 = vmatprep.subr.bf16.mxu1 %v897_v10  ;;  %v917_v23 = vld [vmem:[#allocation5 + $0x40] ss:$16 sps:$4 sm:$0xff]   ;;  %v918_v24 = vld [vmem:[#allocation5 + $0x48] ss:$16 sps:$4 sm:$0xff]   ;;  %v919_v25 = vld [vmem:[#allocation5 + $0x24] ss:$16 sps:$4 sm:$0xff]  }
  0x3d   :  { %v921_v26 = vld [vmem:[#allocation5 + $0x2c] ss:$16 sps:$4 sm:$0xff]   ;;  %v923_v27 = vld [vmem:[#allocation5 + $0x20] ss:$16 sps:$4 sm:$0xff]   ;;  %v924_v28 = vld [vmem:[#allocation5 + $0x28] ss:$16 sps:$4 sm:$0xff]  }
  0x3e   :  { %v925_v29 = vld [vmem:[#allocation5 + $0x4] ss:$16 sps:$4 sm:$0xff]   ;;  %v927_v30 = vld [vmem:[#allocation5 + $0xc] ss:$16 sps:$4 sm:$0xff]   ;;  %v929_v31 = vld [vmem:[#allocation5] ss:$16 sps:$4 sm:$0xff]  }
  0x3f   :  { %303 = vmatpush1.bf16.msra.mxu0 %v899_v11  ;;  %346 = vmatpush1.bf16.msra.mxu1 %v900_v12  ;;  %v930_v32 = vld [vmem:[#allocation5 + $0x8] ss:$16 sps:$4 sm:$0xff]   ;;  %v933_v35 = vld [vmem:[#allocation8 + $0xf8] sm:$0xff]   ;;  %v940_v42 = vld [vmem:[#allocation8 + $0x68] sm:$0xff]   ;;  %v113_v3 = vshrl.u32 %v112_v2, 7  ;;  %s1081_s15 = smov [#allocation10]  }
  0x40   :  { %304 = vmatprep.subr.bf16.mxu0 %v901_v13  ;;  %347 = vmatprep.subr.bf16.mxu1 %v903_v14  ;;  %v931_v34 = vld [vmem:[#allocation2] sm:$0xff]   ;;  %v941_v43 = vld [vmem:[#allocation8 + $0xe8] sm:$0xff]   ;;  %v944_v46 = vld [vmem:[#allocation8 + $0x60] sm:$0xff]   ;;  %s747_s16 = sshll.u32 %s1081_s15, 4  ;;  %s748_s16 = int_to_ptr.vmem [resolvable:$true] %s747_s16 }
  0x41   :  { %v934_v36 = vld [vmem:[#allocation8 + $0x38] sm:$0xff]   ;;  %v936_v38 = vld [vmem:[#allocation8 + $0x70] sm:$0xff]   ;;  %v942_v44 = vld [vmem:[#allocation8 + $0x28] sm:$0xff]   ;;  %v118_v4 = vsub.s32 1, %v113_v3  ;;  %v126_v5 = vsub.s32 3, %v113_v3  ;;  %v114_v6 = vsub.s32 0, %v113_v3  ;;  %p1049_p7 = scmp.lt.s32.totalorder %s748_s16, %s748_s16 }
  0x42   :  { %v935_v37 = vld [vmem:[#allocation8 + $0xb8] sm:$0xff]   ;;  %v937_v39 = vld [vmem:[#allocation8 + $0xf0] sm:$0xff]   ;;  %v943_v45 = vld [vmem:[#allocation8 + $0xa8] sm:$0xff]   ;;  %v122_v7 = vsub.s32 2, %v113_v3 }
  0x43   :  { %305 = vmatpush1.bf16.msra.mxu0 %v905_v15  ;;  %348 = vmatpush1.bf16.msra.mxu1 %v906_v16  ;;  %v938_v40 = vld [vmem:[#allocation8 + $0x30] sm:$0xff]   ;;  %v945_v47 = vld [vmem:[#allocation8 + $0xe0] sm:$0xff]   ;;  %v948_v50 = vld [vmem:[#allocation8 + $0x58] sm:$0xff]  }
  0x44   :  { %306 = vmatprep.subr.bf16.mxu0 %v907_v17  ;;  %349 = vmatprep.subr.bf16.mxu1 %v909_v18  ;;  %v939_v41 = vld [vmem:[#allocation8 + $0xb0] sm:$0xff]   ;;  %v946_v48 = vld [vmem:[#allocation8 + $0x20] sm:$0xff]   ;;  %v949_v51 = vld [vmem:[#allocation8 + $0xd8] sm:$0xff]  }
  0x45   :  { %v947_v49 = vld [vmem:[#allocation8 + $0xa0] sm:$0xff]   ;;  %v950_v52 = vld [vmem:[#allocation8 + $0x18] sm:$0xff]   ;;  %v952_v54 = vld [vmem:[#allocation8 + $0x50] sm:$0xff]  }
  0x46   :  { %v951_v53 = vld [vmem:[#allocation8 + $0x98] sm:$0xff]   ;;  %v953_v55 = vld [vmem:[#allocation8 + $0xd0] sm:$0xff]   ;;  %v956_v58 = vld [vmem:[#allocation8 + $0x48] sm:$0xff]  }
  0x47   :  { %307 = vmatpush1.bf16.msra.mxu0 %v911_v19  ;;  %350 = vmatpush1.bf16.msra.mxu1 %v912_v20  ;;  %v954_v56 = vld [vmem:[#allocation8 + $0x10] sm:$0xff]   ;;  %v957_v59 = vld [vmem:[#allocation8 + $0xc8] sm:$0xff]   ;;  %v960_v62 = vld [vmem:[#allocation8 + $0x40] sm:$0xff]  }
  0x48   :  { %308 = vmatprep.subr.bf16.mxu0 %v913_v21  ;;  %351 = vmatprep.subr.bf16.mxu1 %v915_v22  ;;  %v955_v57 = vld [vmem:[#allocation8 + $0x90] sm:$0xff]   ;;  %v958_v60 = vld [vmem:[#allocation8 + $0x8] sm:$0xff]   ;;  %v961_v63 = vld [vmem:[#allocation8 + $0xc0] sm:$0xff]  }
  0x49   :  { %v959_v61 = vld [vmem:[#allocation8 + $0x88] sm:$0xff]   ;;  %v962_v0 = vld [vmem:[#allocation8] sm:$0xff]   ;;  %v77_v8 = vld [vmem:[#allocation7] sm:$0xf] }
  0x4a   :  { %v963_v1 = vld [vmem:[#allocation8 + $0x80] sm:$0xff]   ;;  %v119_v11 = vrot.slane %v77_v8, %v118_v4  ;;  %v127_v12 = vrot.slane %v77_v8, %v126_v5  ;;  %v115_v13 = vrot.slane %v77_v8, %v114_v6  ;;  %v123_v14 = vrot.slane %v77_v8, %v122_v7 }
  0x4b   :  { %309 = vmatpush1.bf16.msra.mxu0 %v917_v23  ;;  %352 = vmatpush1.bf16.msra.mxu1 %v918_v24 }
  0x4c   :  { %310 = vmatprep.subr.bf16.mxu0 %v919_v25  ;;  %353 = vmatprep.subr.bf16.mxu1 %v921_v26 }
  0x4f   :  { %311 = vmatpush1.bf16.msra.mxu0 %v923_v27  ;;  %354 = vmatpush1.bf16.msra.mxu1 %v924_v28 }
  0x50   :  { %312 = vmatprep.subr.bf16.mxu0 %v925_v29  ;;  %355 = vmatprep.subr.bf16.mxu1 %v927_v30 }
  0x53   :  { %313 = vmatpush1.bf16.msra.mxu0 %v929_v31  ;;  %356 = vmatpush1.bf16.msra.mxu1 %v930_v32 }
  0x54   :  { %827 = vmatprep.subr.bf16.mxu0 %v932_v33  ;;  %849 = vmatprep.subr.bf16.mxu1 %v933_v35 }
  0x56   :  { %331 = vmatmul.mubr.bf16.vlgmr.msra.gmra.mxu0 %v931_v34  ;;  %374 = vmatmul.mubr.bf16.vlgmr.msra.gmra.mxu1 %v931_v34 }
  0x57   :  { %828 = vmatpush3.bf16.msra.mxu0 %v934_v36  ;;  %850 = vmatpush3.bf16.msra.mxu1 %v935_v37 }
  0x58   :  { %829 = vmatprep.subr.bf16.mxu0 %v936_v38  ;;  %851 = vmatprep.subr.bf16.mxu1 %v937_v39 }
  0x5b   :  { %830 = vmatpush3.bf16.msra.mxu0 %v938_v40  ;;  %852 = vmatpush3.bf16.msra.mxu1 %v939_v41 }
  0x5c   :  { %831 = vmatprep.subr.bf16.mxu0 %v940_v42  ;;  %853 = vmatprep.subr.bf16.mxu1 %v941_v43  ;;  %v794_v43 = vld [vmem:[%s1136_s4] ss:$0 sm:$0xff]  ;;  %s1044_s4 = scalar_lea.vmem %s748_s16, 256 }
  0x5d   :  { %p1045_p6 = scmp.ne.s32.totalorder %s748_s16, %s1044_s4  ;;  %p1050_p8 = scmp.lt.s32.totalorder %s1044_s4, %s1044_s4 }
  0x5f   :  { %832 = vmatpush3.bf16.msra.mxu0 %v942_v44  ;;  %854 = vmatpush3.bf16.msra.mxu1 %v943_v45  ;;  %p1051_p9 = por %p1050_p8, %p1049_p7 }
  0x60   :  { %833 = vmatprep.subr.bf16.mxu0 %v944_v46  ;;  %855 = vmatprep.subr.bf16.mxu1 %v945_v47 }
  0x61   :  { %p1052_p10 = pnand %p1051_p9, %p1045_p6 }
  0x63   :  { %834 = vmatpush3.bf16.msra.mxu0 %v946_v48  ;;  %856 = vmatpush3.bf16.msra.mxu1 %v947_v49 }
  0x64   :  { %835 = vmatprep.subr.bf16.mxu0 %v948_v50  ;;  %857 = vmatprep.subr.bf16.mxu1 %v949_v51 }
  0x67   :  { %836 = vmatpush3.bf16.msra.mxu0 %v950_v52  ;;  %858 = vmatpush3.bf16.msra.mxu1 %v951_v53 }
  0x68   :  { %837 = vmatprep.subr.bf16.mxu0 %v952_v54  ;;  %859 = vmatprep.subr.bf16.mxu1 %v953_v55 }
  0x6b   :  { %838 = vmatpush3.bf16.msra.mxu0 %v954_v56  ;;  %860 = vmatpush3.bf16.msra.mxu1 %v955_v57 }
  0x6c   :  { %839 = vmatprep.subr.bf16.mxu0 %v956_v58  ;;  %861 = vmatprep.subr.bf16.mxu1 %v957_v59 }
  0x6f   :  { %840 = vmatpush3.bf16.msra.mxu0 %v958_v60  ;;  %862 = vmatpush3.bf16.msra.mxu1 %v959_v61 }
  0x70   :  { %841 = vmatprep.subr.bf16.mxu0 %v960_v62  ;;  %863 = vmatprep.subr.bf16.mxu1 %v961_v63 }
  0x73   :  { %842 = vmatpush3.bf16.msra.mxu0 %v962_v0  ;;  %864 = vmatpush3.bf16.msra.mxu1 %v963_v1 }
 0x116   :  { %v332_v9 = vpop.f32.mrf.mxu0  ;;  %v375_v10 = vpop.f32.mrf.mxu1 }
 0x117   :  { %v333_v23 = vadd.f32 %v332_v9, %v115_v13  ;;  %v376_v24 = vadd.f32 %v375_v10, %v123_v14 }
 0x118   :  { %v334_v15 = vpop.f32.mrf.mxu0  ;;  %v377_v16 = vpop.f32.mrf.mxu1 }
 0x119   :  { %v335_v19 = vadd.f32 %v334_v15, %v119_v11  ;;  %v378_v20 = vadd.f32 %v377_v16, %v127_v12  ;;  %v384_v35 = vmax.f32 %v333_v23, 0.0  ;;  %v386_v36 = vmax.f32 %v376_v24, 0.0 }
 0x11a   :  { %v336_v17 = vpop.f32.mrf.mxu0  ;;  %v379_v18 = vpop.f32.mrf.mxu1 }
 0x11b   :  { %v337_v21 = vadd.f32 %v336_v17, %v115_v13  ;;  %v380_v22 = vadd.f32 %v379_v18, %v123_v14  ;;  %v385_v31 = vmax.f32 %v335_v19, 0.0  ;;  %v387_v32 = vmax.f32 %v378_v20, 0.0 }
 0x11c   :  { %v338_v25 = vpop.f32.mrf.mxu0  ;;  %v381_v26 = vpop.f32.mrf.mxu1 }
 0x11d   :  { %v339_v27 = vadd.f32 %v338_v25, %v119_v11  ;;  %v382_v28 = vadd.f32 %v381_v26, %v127_v12  ;;  %v388_v29 = vmax.f32 %v337_v21, 0.0  ;;  %v390_v30 = vmax.f32 %v380_v22, 0.0 }
 0x11f   :  { %v389_v33 = vmax.f32 %v339_v27, 0.0  ;;  %v391_v34 = vmax.f32 %v382_v28, 0.0  ;;  %v392_v39 = vpack.c.bf16 %v388_v29, %v384_v35  ;;  %v394_v40 = vpack.c.bf16 %v390_v30, %v386_v36 }
 0x121   :  { %v393_v37 = vpack.c.bf16 %v389_v33, %v385_v31  ;;  %v395_v38 = vpack.c.bf16 %v391_v34, %v387_v32 }
 0x123   :  { %690 = vmatprep.mubr.bf16.mxu0 %v393_v37  ;;  %731 = vmatprep.mubr.bf16.mxu1 %v395_v38 }
 0x124   :  { %691 = vmatmul.mubr.bf16.vlgmr.msra.gmra.mxu0 %v392_v39  ;;  %732 = vmatmul.mubr.bf16.vlgmr.msra.gmra.mxu1 %v394_v40 }
 0x1e4   :  { %v843_v41 = vpop.f32.mrf.mxu0  ;;  %v865_v42 = vpop.f32.mrf.mxu1 }
 0x1e6   :  { %v844_v44 = vpop.f32.mrf.mxu0  ;;  %v866_v45 = vpop.f32.mrf.mxu1 }
 0x1e7   :  { %v845_v46 = vadd.f32 %v844_v44, %v843_v41  ;;  %v867_v50 = vadd.f32 %v866_v45, %v865_v42 }
 0x1e8   :  { %v846_v47 = vpop.f32.mrf.mxu0  ;;  %v868_v48 = vpop.f32.mrf.mxu1 }
 0x1e9   :  { %v693_v49 = vadd.f32 %v845_v46, %v794_v43 }
 0x1ea   :  { %v847_v51 = vpop.f32.mrf.mxu0  ;;  %v869_v52 = vpop.f32.mrf.mxu1 }
 0x1eb   :  { %v734_v53 = vadd.f32 %v867_v50, %v693_v49  ;;  %v848_v54 = vadd.f32 %v847_v51, %v846_v47  ;;  %v870_v56 = vadd.f32 %v869_v52, %v868_v48 }
 0x1ed   :  { %740 = vst [vmem:[#allocation10] sm:$0xff] %v734_v53  ;;  %v696_v55 = vadd.f32 %v848_v54, %v794_v43 }
 0x1ef   :  { %v737_v57 = vadd.f32 %v870_v56, %v696_v55 }
 0x1f1   :  { %741 = vst [vmem:[#allocation10 + $0x8] sm:$0xff] %v737_v57 }
 0x1f2   :  { %1055 = shalt.err (!%p1052_p10)
}
 0x1f3   :  { %s1082_s17 = smov 128   ;;  %s1083_s18 = smov 8  }
 0x1f4   :  { %753 = dma.vmem_to_hbm [thread:$0]  %s748_s16, 256, %s1137_s5, [#allocation4], %s1082_s17, %s1082_s17, %s1083_s18  }
 0x1f5   :  { %1070 = dma.done.wait [#allocation4], 256  }
 0x1f6   :  { %1071 = vsyncadd [#allocation4], 4294967040 }
 0x1f7   :  { %757 = vsyncpa [#allocation3], 1 }
 0x1f8   :  { %758 = vsyncpa [#allocation6], 1 }
 0x1f9   :  { %759 = vsyncpa [#allocation9], 1 }
 0x1fa   :  { %760 = vsyncpa [#allocation4], 1 }

</bundles_post_ra>
